<compile_context>
chip_gen: v6e
topology: v6e:2x2x1
jax: 0.10.0
libtpu: 0.0.40
codegen_flags: <defaults>
</compile_context>

<pallas_src>
import functools

import jax
import jax.numpy as jnp
from jax import lax
from jax.experimental import pallas as pl
from jax.experimental.pallas import tpu as pltpu


def _round_up(x, m):
    return ((x + m - 1) // m) * m


def _cdiv(a, b):
    return (a + b - 1) // b


def _gather_kernel(idx_ref, tbl_ref, out_ref, *, block_rows, n_rows):
    """One-hot MXU gather of `block_rows` fused-table rows.

    idx_ref : VMEM (R, 1)       int32  indices for this block
    tbl_ref : VMEM (3, n, D+1)  bf16   exact 3-plane split of the fused [W|b] table
    out_ref : VMEM (R, D+1)     f32    gathered rows
    """
    idx = idx_ref[...]                                               # (R, 1)
    col = lax.broadcasted_iota(jnp.int32, (block_rows, n_rows), 1)   # (R, n)
    onehot = (col == idx).astype(jnp.bfloat16)                       # (R, n)

    # Three exact bf16 planes -> three bf16 MXU matmuls accumulated in f32.
    # One-hot rows are exactly {0, 1}, so each matmul returns the exact f32
    # value of the selected plane entry; t0 + t1 + t2 reconstructs the original
    # f32 table row bit-exactly.
    acc = jnp.dot(onehot, tbl_ref[0], preferred_element_type=jnp.float32)
    acc = acc + jnp.dot(onehot, tbl_ref[1], preferred_element_type=jnp.float32)
    acc = acc + jnp.dot(onehot, tbl_ref[2], preferred_element_type=jnp.float32)
    out_ref[...] = acc


def _split_bf16_planes(x_f32):
    """Exact 3-way bf16 decomposition: t0 + t1 + t2 == x_f32 (bit-exact in f32)."""
    t0 = x_f32.astype(jnp.bfloat16)
    r1 = x_f32 - t0.astype(jnp.float32)
    t1 = r1.astype(jnp.bfloat16)
    r2 = r1 - t1.astype(jnp.float32)
    t2 = r2.astype(jnp.bfloat16)
    return jnp.stack([t0, t1, t2], axis=0)          # (3, n, D+1) bf16


def embedding_with_bias(idx, W, b, *, target_block_bytes=1 << 20,
                        onehot_block_bytes=4 << 20):
    """Pallas equivalent of EmbeddingWithBias.forward: returns (W[idx], b[idx])."""
    orig_shape = idx.shape
    n, D = W.shape
    Dp = D + 1

    idx_flat = idx.reshape(-1).astype(jnp.int32)
    # torch.nn.Embedding raises on out-of-range ids; we clamp so the in-kernel
    # one-hot gather stays in bounds (documented semantic difference).
    idx_flat = jnp.clip(idx_flat, 0, n - 1)
    num_idx = idx_flat.shape[0]
    if num_idx == 0:
        return (jnp.zeros(orig_shape + (D,), W.dtype),
                jnp.zeros(orig_shape + (1,), b.dtype))

    # Fused [W | b] table, exactly decomposed into three bf16 planes.
    table_f32 = jnp.concatenate(
        [W.astype(jnp.float32), b.reshape(n, 1).astype(jnp.float32)], axis=1)
    table = _split_bf16_planes(table_f32)            # (3, n, Dp) bf16

    # Rows per grid step: multiple of 8, sized toward ~1 MiB output blocks,
    # capped so the (R, n) one-hot intermediate stays small, and split so the
    # "parallel" grid axis has >= 2 steps when there is enough work (v7x: 2 TCs).
    rows = _round_up(num_idx, 8)
    R = max(8, (target_block_bytes // (Dp * 4)) // 8 * 8)
    R = min(R, max(8, (onehot_block_bytes // (n * 2)) // 8 * 8))
    R = min(R, rows)
    if rows >= 16 and _cdiv(rows, R) < 2:
        R = max(8, _round_up(_cdiv(rows, 2), 8))
    num_pad = _round_up(num_idx, R)
    grid = (num_pad // R,)

    idx_pad = jnp.pad(idx_flat, (0, num_pad - num_idx)).reshape(num_pad, 1)

    # Explicit VMEM budget (review: re-derive instead of a fixed constant so the
    # same kernel stays inside v7x's 64 MiB): resident table (worst case double-
    # buffered), pipelined idx/output blocks, one-hot + matmul temporaries.
    need = (2 * (3 * n * Dp * 2)          # bf16 table planes (x2 if double-buffered)
            + 2 * R * Dp * 4              # output blocks (double-buffered)
            + 2 * R * 4                   # idx blocks (double-buffered)
            + R * n * 2                   # one-hot intermediate
            + 2 * R * Dp * 4)             # matmul accumulators / copies
    vmem_limit = int(min(max(2 * need + (4 << 20), 32 << 20), 96 << 20))

    kernel = functools.partial(_gather_kernel, block_rows=R, n_rows=n)

    def build_call(single_buffer_table):
        tbl_kwargs = {}
        if single_buffer_table:
            # Constant index_map -> the second pipeline buffer is never used;
            # keep a single resident copy of the table in VMEM.
            tbl_kwargs["pipeline_mode"] = pl.Buffered(1)
        grid_spec = pltpu.PrefetchScalarGridSpec(
            num_scalar_prefetch=0,
            grid=grid,
            in_specs=[
                pl.BlockSpec((R, 1), lambda i: (i, 0)),
                pl.BlockSpec((3, n, Dp), lambda i: (0, 0, 0), **tbl_kwargs),
            ],
            out_specs=pl.BlockSpec((R, Dp), lambda i: (i, 0)),
        )
        return pl.pallas_call(
            kernel,
            out_shape=jax.ShapeDtypeStruct((num_pad, Dp), jnp.float32),
            grid_spec=grid_spec,
            compiler_params=pltpu.CompilerParams(
                dimension_semantics=("parallel",),
                vmem_limit_bytes=vmem_limit,
            ),
        )

    try:
        out = build_call(single_buffer_table=True)(idx_pad, table)
    except Exception:
        # pipeline_mode=pl.Buffered(1) not supported on this jax build: fall back
        # to the default double-buffered (but still constant-index) table spec.
        out = build_call(single_buffer_table=False)(idx_pad, table)

    out = out[:num_idx]
    w_out = out[:, :D].reshape(orig_shape + (D,)).astype(W.dtype)
    b_out = out[:, D:].reshape(orig_shape + (1,)).astype(b.dtype)
    return w_out, b_out


if __name__ == "__main__":
    n = 64              # vocabulary size
    embedding_dim = 32  # embedding width

    key = jax.random.PRNGKey(0)
    k_w, k_b, k_idx, k_idx2 = jax.random.split(key, 4)

    # torch.nn.Embedding initializes weights ~ N(0, 1); replicate deterministically.
    W = jax.random.normal(k_w, (n, embedding_dim), dtype=jnp.float32)
    b = jax.random.normal(k_b, (n, 1), dtype=jnp.float32)

    # Small test: idx of shape (batch=2, seq=8) -> exercises a 2-step grid.
    idx = jax.random.randint(k_idx, (2, 8), 0, n, dtype=jnp.int32)
    w_emb, b_emb = embedding_with_bias(idx, W, b)
    jax.block_until_ready((w_emb, b_emb))

    assert w_emb.shape == (2, 8, embedding_dim)
    assert b_emb.shape == (2, 8, 1)
    assert jnp.array_equal(w_emb, W[idx])
    assert jnp.array_equal(b_emb, b[idx])

    # Larger test exercising padding + multi-block path.
    idx2 = jax.random.randint(k_idx2, (4, 300), 0, n, dtype=jnp.int32)
    w2, b2 = embedding_with_bias(idx2, W, b)
    jax.block_until_ready((w2, b2))

    assert w2.shape == (4, 300, embedding_dim)
    assert b2.shape == (4, 300, 1)
    assert jnp.array_equal(w2, W[idx2])
    assert jnp.array_equal(b2, b[idx2])

    print("KERNEL_OK")
</pallas_src>

<mosaic_0001>
module attributes {stable_mosaic.version = 11 : i64} {
  func.func @_gather_kernel(%arg0: i32, %arg1: memref<8x1xi32, #tpu.memory_space<vmem>>, %arg2: memref<3x64x33xbf16, #tpu.memory_space<vmem>>, %arg3: memref<8x33xf32, #tpu.memory_space<vmem>>) attributes {dimension_semantics = [#tpu.dimension_semantics<parallel>], iteration_bounds = array<i64: 2>, scalar_prefetch = 0 : i64, scratch_operands = 0 : i64, tpu.core_type = #tpu.core_type<tc>, window_params = [{transform_indices = @transform_0, window_bounds = array<i64: 8, 1>}, {pipeline_mode = #tpu.pipeline_mode<synchronous>, transform_indices = @transform_1, window_bounds = array<i64: 3, 64, 33>}, {transform_indices = @transform_2, window_bounds = array<i64: 8, 33>}]} {
    %c0 = arith.constant 0 : index
    %c0_0 = arith.constant 0 : index
    %0 = vector.load %arg1[%c0, %c0_0] : memref<8x1xi32, #tpu.memory_space<vmem>>, vector<8x1xi32>
    %1 = tpu.iota {dimensions = array<i32: 1>} : vector<8x64xi32>
    %2 = vector.broadcast %0 : vector<8x1xi32> to vector<8x64xi32>
    %3 = arith.cmpi eq, %1, %2 : vector<8x64xi32>
    %4 = arith.extui %3 : vector<8x64xi1> to vector<8x64xi32>
    %5 = arith.sitofp %4 : vector<8x64xi32> to vector<8x64xf32>
    %6 = arith.truncf %5 : vector<8x64xf32> to vector<8x64xbf16>
    %c0_1 = arith.constant 0 : index
    %c0_2 = arith.constant 0 : index
    %c0_3 = arith.constant 0 : index
    %7 = vector.load %arg2[%c0_1, %c0_2, %c0_3] : memref<3x64x33xbf16, #tpu.memory_space<vmem>>, vector<1x64x33xbf16>
    %8 = vector.shape_cast %7 : vector<1x64x33xbf16> to vector<64x33xbf16>
    %cst = arith.constant dense<0.000000e+00> : vector<8x33xf32>
    %9 = tpu.matmul %6, %8, %cst {dimension_numbers = #tpu.dot_dimension_numbers<[1], [0], [0], [1], [0, 0, 1, 1], [], []>} : vector<8x64xbf16>, vector<64x33xbf16>, vector<8x33xf32> -> vector<8x33xf32>
    %c1 = arith.constant 1 : index
    %c0_4 = arith.constant 0 : index
    %c0_5 = arith.constant 0 : index
    %10 = vector.load %arg2[%c1, %c0_4, %c0_5] : memref<3x64x33xbf16, #tpu.memory_space<vmem>>, vector<1x64x33xbf16>
    %11 = vector.shape_cast %10 : vector<1x64x33xbf16> to vector<64x33xbf16>
    %cst_6 = arith.constant dense<0.000000e+00> : vector<8x33xf32>
    %12 = tpu.matmul %6, %11, %cst_6 {dimension_numbers = #tpu.dot_dimension_numbers<[1], [0], [0], [1], [0, 0, 1, 1], [], []>} : vector<8x64xbf16>, vector<64x33xbf16>, vector<8x33xf32> -> vector<8x33xf32>
    %13 = arith.addf %9, %12 : vector<8x33xf32>
    %c2 = arith.constant 2 : index
    %c0_7 = arith.constant 0 : index
    %c0_8 = arith.constant 0 : index
    %14 = vector.load %arg2[%c2, %c0_7, %c0_8] : memref<3x64x33xbf16, #tpu.memory_space<vmem>>, vector<1x64x33xbf16>
    %15 = vector.shape_cast %14 : vector<1x64x33xbf16> to vector<64x33xbf16>
    %cst_9 = arith.constant dense<0.000000e+00> : vector<8x33xf32>
    %16 = tpu.matmul %6, %15, %cst_9 {dimension_numbers = #tpu.dot_dimension_numbers<[1], [0], [0], [1], [0, 0, 1, 1], [], []>} : vector<8x64xbf16>, vector<64x33xbf16>, vector<8x33xf32> -> vector<8x33xf32>
    %17 = arith.addf %13, %16 : vector<8x33xf32>
    %c0_10 = arith.constant 0 : index
    %c0_11 = arith.constant 0 : index
    %18 = vector.load %arg3[%c0_10, %c0_11] : memref<8x33xf32, #tpu.memory_space<vmem>>, vector<8x33xf32>
    tpu.vector_store %arg3[%c0_10, %c0_11], %17 {strides = array<i32>} : memref<8x33xf32, #tpu.memory_space<vmem>>, vector<8x33xf32>,
    return
  }
  func.func @transform_0(%arg0: i32) -> (i32, i32) {
    %c0_i32 = arith.constant 0 : i32
    %c0_i32_0 = arith.constant 0 : i32
    return %arg0, %c0_i32 : i32, i32
  }
  func.func @transform_1(%arg0: i32) -> (i32, i32, i32) {
    %c0_i32 = arith.constant 0 : i32
    %c0_i32_0 = arith.constant 0 : i32
    %c0_i32_1 = arith.constant 0 : i32
    %c0_i32_2 = arith.constant 0 : i32
    return %c0_i32, %c0_i32_0, %c0_i32_1 : i32, i32, i32
  }
  func.func @transform_2(%arg0: i32) -> (i32, i32) {
    %c0_i32 = arith.constant 0 : i32
    %c0_i32_0 = arith.constant 0 : i32
    return %arg0, %c0_i32 : i32, i32
  }
}

module attributes {stable_mosaic.version = 11 : i64} {
  func.func @_gather_kernel(%arg0: i32, %arg1: memref<8x1xi32, #tpu.memory_space<vmem>>, %arg2: memref<3x64x33xbf16, #tpu.memory_space<vmem>>, %arg3: memref<8x33xf32, #tpu.memory_space<vmem>>) attributes {dimension_semantics = [#tpu.dimension_semantics<parallel>], iteration_bounds = array<i64: 2>, scalar_prefetch = 0 : i64, scratch_operands = 0 : i64, tpu.core_type = #tpu.core_type<tc>, window_params = [{transform_indices = @transform_0, window_bounds = array<i64: 8, 1>}, {pipeline_mode = #tpu.pipeline_mode<synchronous>, transform_indices = @transform_1, window_bounds = array<i64: 3, 64, 33>}, {transform_indices = @transform_2, window_bounds = array<i64: 8, 33>}]} {
    %c0 = arith.constant 0 : index
    %c0_0 = arith.constant 0 : index
    %0 = vector.load %arg1[%c0, %c0_0] : memref<8x1xi32, #tpu.memory_space<vmem>>, vector<8x1xi32>
    %1 = tpu.iota {dimensions = array<i32: 1>} : vector<8x64xi32>
    %2 = vector.broadcast %0 : vector<8x1xi32> to vector<8x64xi32>
    %3 = arith.cmpi eq, %1, %2 : vector<8x64xi32>
    %4 = arith.extui %3 : vector<8x64xi1> to vector<8x64xi32>
    %5 = arith.sitofp %4 : vector<8x64xi32> to vector<8x64xf32>
    %6 = arith.truncf %5 : vector<8x64xf32> to vector<8x64xbf16>
    %c0_1 = arith.constant 0 : index
    %c0_2 = arith.constant 0 : index
    %c0_3 = arith.constant 0 : index
    %7 = vector.load %arg2[%c0_1, %c0_2, %c0_3] : memref<3x64x33xbf16, #tpu.memory_space<vmem>>, vector<1x64x33xbf16>
    %8 = vector.shape_cast %7 : vector<1x64x33xbf16> to vector<64x33xbf16>
    %cst = arith.constant dense<0.000000e+00> : vector<8x33xf32>
    %9 = tpu.matmul %6, %8, %cst {dimension_numbers = #tpu.dot_dimension_numbers<[1], [0], [0], [1], [0, 0, 1, 1], [], []>} : vector<8x64xbf16>, vector<64x33xbf16>, vector<8x33xf32> -> vector<8x33xf32>
    %c1 = arith.constant 1 : index
    %c0_4 = arith.constant 0 : index
    %c0_5 = arith.constant 0 : index
    %10 = vector.load %arg2[%c1, %c0_4, %c0_5] : memref<3x64x33xbf16, #tpu.memory_space<vmem>>, vector<1x64x33xbf16>
    %11 = vector.shape_cast %10 : vector<1x64x33xbf16> to vector<64x33xbf16>
    %cst_6 = arith.constant dense<0.000000e+00> : vector<8x33xf32>
    %12 = tpu.matmul %6, %11, %cst_6 {dimension_numbers = #tpu.dot_dimension_numbers<[1], [0], [0], [1], [0, 0, 1, 1], [], []>} : vector<8x64xbf16>, vector<64x33xbf16>, vector<8x33xf32> -> vector<8x33xf32>
    %13 = arith.addf %9, %12 : vector<8x33xf32>
    %c2 = arith.constant 2 : index
    %c0_7 = arith.constant 0 : index
    %c0_8 = arith.constant 0 : index
    %14 = vector.load %arg2[%c2, %c0_7, %c0_8] : memref<3x64x33xbf16, #tpu.memory_space<vmem>>, vector<1x64x33xbf16>
    %15 = vector.shape_cast %14 : vector<1x64x33xbf16> to vector<64x33xbf16>
    %cst_9 = arith.constant dense<0.000000e+00> : vector<8x33xf32>
    %16 = tpu.matmul %6, %15, %cst_9 {dimension_numbers = #tpu.dot_dimension_numbers<[1], [0], [0], [1], [0, 0, 1, 1], [], []>} : vector<8x64xbf16>, vector<64x33xbf16>, vector<8x33xf32> -> vector<8x33xf32>
    %17 = arith.addf %13, %16 : vector<8x33xf32>
    %c0_10 = arith.constant 0 : index
    %c0_11 = arith.constant 0 : index
    %18 = vector.load %arg3[%c0_10, %c0_11] : memref<8x33xf32, #tpu.memory_space<vmem>>, vector<8x33xf32>
    tpu.vector_store %arg3[%c0_10, %c0_11], %17 {strides = array<i32>} : memref<8x33xf32, #tpu.memory_space<vmem>>, vector<8x33xf32>,
    return
  }
  func.func @transform_0(%arg0: i32) -> (i32, i32) {
    %c0_i32 = arith.constant 0 : i32
    %c0_i32_0 = arith.constant 0 : i32
    return %arg0, %c0_i32 : i32, i32
  }
  func.func @transform_1(%arg0: i32) -> (i32, i32, i32) {
    %c0_i32 = arith.constant 0 : i32
    %c0_i32_0 = arith.constant 0 : i32
    %c0_i32_1 = arith.constant 0 : i32
    %c0_i32_2 = arith.constant 0 : i32
    return %c0_i32, %c0_i32_0, %c0_i32_1 : i32, i32, i32
  }
  func.func @transform_2(%arg0: i32) -> (i32, i32) {
    %c0_i32 = arith.constant 0 : i32
    %c0_i32_0 = arith.constant 0 : i32
    return %arg0, %c0_i32 : i32, i32
  }
}

</mosaic_0001>

<bundles_post_ra>
// kernel: tpu_custom_call.1
= control target key start
LH: loop header
LB: loop body
LE: loop exit
PB: predicated region body
PF: predicated region fallthrough
CT: control target
= control target key end

     0   :  { %7 = vsyncpa [#allocation3], 0  ;;  %s818_s0 = inlined_call_operand.vmem [shape: s32[16,1], index: 0, kind: input, shape index: {}]   ;;  %s819_s1 = inlined_call_operand.vmem [shape: bf16[3,64,33], index: 1, kind: input, shape index: {}]   ;;  %s820_s2 = inlined_call_operand.hbm [shape: f32[16,33], index: 2, kind: output, shape index: {}]  }
   0x1   :  { %9 = vsyncpa [#allocation3 + $0x1], 0  ;;  %s677_s9 = smov 0   ;;  %s679_s10 = smov 0  }
   0x2   :  { %s681_s11 = smov 0   ;;  %s683_s12 = smov 0  }
   0x3 LB: > { %s698_s13 = sadd.s32 4294967295, %s656_s12   ;;  %s448_s14 = sadd.s32 4294967294, %s656_s12   ;;  %s656_s12 = sphi %s683_s12, %s826_s12   ;;  %s652_s11 = sphi %s681_s11, %s825_s11   ;;  %s648_s10 = sphi %s679_s10, %s824_s10   ;;  %s644_s9 = sphi %s677_s9, %s823_s9  }
   0x4   : > { %s702_s15 = sadd.s32 1, %s656_s12   ;;  %s69_s16 = sadd.s32 1, %s652_s11 }
   0x5   : > { %s66_s17 = ssub.s32 %s656_s12, %s702_s15  ;;  %p79_p0 = scmp.ne.s32.totalorder %s652_s11, %s648_s10 }
   0x6   : > { %p67_p1 = scmp.eq.s32.totalorder %s66_s17, 0  ;;  %p80_p2 = scmp.eq.s32.totalorder %s698_s13, 1 }
   0x7   : > { %p85_p3 = scmp.ne.s32.totalorder %s648_s10, %s644_s9  ;;  %p86_p4 = scmp.eq.s32.totalorder %s448_s14, 1 }
   0x8   : > { %s713_s18 = scalar_select %p67_p1, %s652_s11, %s69_s16  }
   0x9   : > { %p715_p5 = por %p80_p2, %p79_p0  ;;  %p719_p6 = por %p86_p4, %p85_p3 }
   0xa   : > { %p451_p7 = scmp.ge.s32.totalorder %s656_s12, 1  ;;  %p114_p8 = scmp.lt.s32.totalorder %s656_s12, 3 }
   0xc   : > { %p115_p9 = pnand %p451_p7, %p114_p8 }
   0xd   : > { %p135_p10 = scmp.lt.s32.totalorder (!%p115_p9), %s698_s13, 1  ;;  %s132_s3 = sand.u32 (!%p115_p9), 1, %s648_s10  }
   0xe   : > { %118 = sbr.rel (%p115_p9) target bundleno = 377 (0x179), region = 28  ;;  %s452_s4 = sshll.u32 (!%p115_p9), %s132_s3, 3 }
   0xf   : > { %s134_s6 = scalar_lea.vmem (!%p115_p9), [#allocation2], %s452_s4  ;;  %s661_s21 = smov (!%p115_p9), [#allocation2]  }
  0x10   : > { %s389_s7 = sshll.u32 (!%p115_p9), %s134_s6, 4  ;;  %s600_s22 = sshll.u32 (!%p115_p9), %s661_s21, 4  ;;  %s779_s7 = int_to_ptr.vmem [resolvable:$true] %s389_s7  ;;  %s601_s22 = int_to_ptr.vmem [resolvable:$false] %s600_s22 }
  0x11   : > { %s596_s17 = scalar_lea.vmem (!%p115_p9), %s779_s7, 128  ;;  %p603_p0 = scmp.lt.s32.totalorder (!%p115_p9), %s779_s7, %s601_s22 }
  0x12   : > { %p597_p11 = scmp.ne.s32.totalorder (!%p115_p9), %s779_s7, %s596_s17 }
  0x13   : > { %v584_v0 = vld [vmem:[%s819_s1 + $0x38] sm:$0xff]   ;;  %v658_v1 = vmov 0   ;;  %v659_v2 = vmov 0.0   ;;  %s136_s23 = scalar_select %p135_p10, %s698_s13, 1  ;;  %v586_v4 = vld [vmem:[%s819_s1 + $0x30] sm:$0xff]   ;;  %v588_v7 = vld [vmem:[%s819_s1 + $0x28] sm:$0xff]   ;;  %v141_v11 = vlaneseq }
  0x14   : > { %583 = vset.pattern.permute.xlu0 %v658_v1  ;;  %505 = vmatprep.subr.bf16.mxu0 %v659_v2  ;;  %v585_v3 = vld [vmem:[%s819_s1 + $0x18] sm:$0xff]   ;;  %v587_v5 = vld [vmem:[%s819_s1 + $0x10] sm:$0xff]   ;;  %vm660_vm0 = vmmov 0   ;;  %v589_v8 = vld [vmem:[%s819_s1 + $0x8] sm:$0xff]   ;;  %vm191_vm2 = vcmask 523264   ;;  %vm373_vm3 = vcmask 269312   ;;  %p598_p12 = pnand %p597_p11, %p715_p5 }
  0x15   : > { %506 = vmatpush3.bf16.msra.mxu0 %v584_v0  ;;  %517 = vmatprep.subr.bf16.mxu1 %v659_v2  ;;  %s453_s28 = sshll.u32 %s136_s23, 3  ;;  %v590_v9 = vld [vmem:[%s819_s1 + $0x20] sm:$0xff]   ;;  %v142_v12 = vand.u32 127, %v141_v11  ;;  %v592_v15 = vld [vmem:[%s819_s1 + $0x58] sm:$0xff]   ;;  %v593_v17 = vld [vmem:[%s819_s1 + $0x50] sm:$0xff]   ;;  %s602_s23 = scalar_lea.vmem %s601_s22, 256 }
  0x16   : > { %507 = vmatprep.subr.bf16.mxu0 %v659_v2  ;;  %518 = vmatpush3.bf16.msra.mxu1 %v585_v3  ;;  %s138_s5 = scalar_lea.vmem %s818_s0, %s453_s28  ;;  %v591_v10 = vld [vmem:[%s819_s1] sm:$0xff]   ;;  %v594_v18 = vld [vmem:[%s819_s1 + $0x48] sm:$0xff]   ;;  %p599_p13 = pneg %p598_p12 }
  0x17   : > { %519 = vmatprep.subr.bf16.mxu1 %v659_v2  ;;  %v140_v6 = vld [vmem:[%s138_s5] sm:$0xff]  ;;  %513 = vmatprep.mubr.msk.bf16.mxu0 %vm660_vm0, %v659_v2  ;;  %s487_s5 = sshll.u32 %s698_s13, 7  ;;  %s376_s13 = scalar_lea.sflag [#allocation3], %s132_s3 }
  0x18   : > { %144 = vperm.xlu0 %583, %v140_v6   ;;  %525 = vmatprep.mubr.msk.bf16.mxu1 %vm660_vm0, %v659_v2  ;;  %v595_v19 = vld [vmem:[%s819_s1 + $0x40] sm:$0xff]   ;;  %s777_s16 = scalar_lea.hbm %s820_s2, %s487_s5  ;;  %p604_p1 = scmp.lt.s32.totalorder %s602_s23, %s596_s17 }
  0x19   : > { %508 = vmatpush3.bf16.msra.mxu0 %v586_v4 }
  0x1a   : > { %509 = vmatprep.subr.bf16.mxu0 %v659_v2  ;;  %520 = vmatpush3.bf16.msra.mxu1 %v587_v5  ;;  %p605_p2 = por %p604_p1, %p603_p0 }
  0x1b   : > { %521 = vmatprep.subr.bf16.mxu1 %v659_v2 }
  0x1c   : > { %p606_p3 = pnand %p605_p2, %p599_p13 }
  0x1d   : > { %510 = vmatpush3.bf16.msra.mxu0 %v588_v7 }
  0x1e   : > { %511 = vmatprep.subr.bf16.mxu0 %v659_v2  ;;  %522 = vmatpush3.bf16.msra.mxu1 %v589_v8 }
  0x1f   : > { %523 = vmatprep.subr.bf16.mxu1 %v659_v2 }
  0x21   : > { %512 = vmatpush3.bf16.msra.mxu0 %v590_v9 }
  0x22   : > { %529 = vmatprep.subr.bf16.mxu0 %v659_v2  ;;  %524 = vmatpush3.bf16.msra.mxu1 %v591_v10 }
  0x93   : > { %v145_v13 = vpop.permute.xlu0 %144 }
  0x94   : > { %vm146_vm1 = vcmp.eq.s32.totalorder %v142_v12, %v145_v13 }
  0x95   : > { %v454_v14 = vsel %vm146_vm1, 1.0, %v659_v2 }
  0x96   : > { %v149_v16 = vpack.c.bf16 %v454_v14, %v454_v14 }
  0x98   : > { %514 = vmatmul.mubr.msk.bf16.vlgmr.msra.gmra.mxu0 %vm191_vm2, %v149_v16  ;;  %526 = vmatmul.mubr.msk.bf16.vlgmr.msra.gmra.mxu1 %vm191_vm2, %v149_v16 }
  0x99   : > { %530 = vmatpush3.bf16.msra.mxu0 %v592_v15  ;;  %537 = vmatprep.mubr.msk.bf16.mxu0 %vm660_vm0, %v659_v2 }
  0x9a   : > { %531 = vmatprep.subr.bf16.mxu0 %v659_v2 }
  0x9d   : > { %532 = vmatpush3.bf16.msra.mxu0 %v593_v17 }
  0x9e   : > { %533 = vmatprep.subr.bf16.mxu0 %v659_v2 }
  0xa1   : > { %534 = vmatpush3.bf16.msra.mxu0 %v594_v18 }
  0xa2   : > { %535 = vmatprep.subr.bf16.mxu0 %v659_v2 }
  0xa5   : > { %536 = vmatpush3.bf16.msra.mxu0 %v595_v19 }
  0xa8   : > { %538 = vmatmul.mubr.msk.bf16.vlgmr.msra.gmra.mxu0 %vm191_vm2, %v149_v16 }
 0x158   : > { %v229_v20 = vpop.f32.mrf.mxu0  ;;  %v293_v21 = vpop.f32.mrf.mxu1 }
 0x159   : > { %v294_v28 = vadd.f32 %v293_v21, %v229_v20 }
 0x15a   : > { %v515_v22 = vpop.f32.mrf.mxu0  ;;  %v527_v23 = vpop.f32.mrf.mxu1 }
 0x15c   : > { %v232_v24 = vpop.f32.mrf.mxu0  ;;  %v296_v25 = vpop.f32.mrf.mxu1 }
 0x15e   : > { %v516_v26 = vpop.f32.mrf.mxu0  ;;  %v528_v27 = vpop.f32.mrf.mxu1 }
 0x168   : > { %v366_v29 = vpop.f32.mrf.mxu0 }
 0x169   : > { %v372_v30 = vadd.f32 %v366_v29, %v294_v28 }
 0x16a   : > { %v539_v31 = vpop.f32.mrf.mxu0 }
 0x16b   : > { %374 = vst.msk [vmem:[%s134_s6] sm:$0xff] %vm373_vm3, %v372_v30 }
 0x16c   : > { %v369_v32 = vpop.f32.mrf.mxu0 }
 0x16d   : > { %609 = shalt.err (!%p606_p3)
}
 0x16e   : > { %s610_s24 = scalar_lea.hbm %s777_s16, 128  ;;  %s614_s27 = scalar_lea.hbm %s820_s2, 256 }
 0x16f   : > { %p611_p4 = scmp.ne.s32.totalorder %s777_s16, %s610_s24  ;;  %p615_p9 = scmp.lt.s32.totalorder %s777_s16, %s820_s2 }
 0x170   : > { %p616_p10 = scmp.lt.s32.totalorder %s614_s27, %s610_s24 }
 0x171   : > { %p612_p7 = pnand %p611_p4, %p715_p5 }
 0x172   : > { %p617_p11 = por %p616_p10, %p615_p9 }
 0x173   : > { %p613_p8 = pneg %p612_p7 }
 0x175   : > { %p618_p12 = pnand %p617_p11, %p613_p8 }
 0x177   : > { %621 = shalt.err (!%p618_p12)
}
 0x178   : > { %541 = dma.vmem_to_hbm [thread:$0]  (%p715_p5), %s779_s7, 128, %s777_s16, %s376_s13   ;;  %v540_v33 = vpop.f32.mrf.mxu0 }
 0x179 PF: > { %p547_p13 = scmp.ge.s32.totalorder %s656_s12, 2  ;;  %s401_s30 = sand.u32 1, %s644_s9  }
 0x17a   : > { %s402_s3 = scalar_lea.sflag [#allocation3], %s401_s30 }
 0x17b   : > { %p544_p0 = pnand %p547_p13, %p719_p6 }
 0x17d   : > { %p545_p1 = pneg %p544_p0 }
 0x17f   : > { %639 = dma.done.wait (%p545_p1), %s402_s3, 128  }
 0x180   : > { %641 = vsyncadd (%p545_p1), %s402_s3, 4294967168  ;;  %p12_p2 = scmp.ge.s32.totalorder %s702_s15, 4   ;;  %s823_s9 = smov %s648_s10 }
 0x181   : > { %s824_s10 = smov %s652_s11  ;;  %s825_s11 = smov %s713_s18 }
 0x182   : > { %s826_s12 = smov %s702_s15  ;;  %14 = sbr.rel (!%p12_p2) target bundleno = 3 (0x3), region = 65 }
 0x187   :  { %407 = vsyncpa [#allocation3], 1 }
 0x188   :  { %409 = vsyncpa [#allocation3 + $0x1], 1 }

// kernel: tpu_custom_call.1
= control target key start
LH: loop header
LB: loop body
LE: loop exit
PB: predicated region body
PF: predicated region fallthrough
CT: control target
= control target key end

     0   :  { %7 = vsyncpa [#allocation3], 0  ;;  %s818_s0 = inlined_call_operand.vmem [shape: s32[16,1], index: 0, kind: input, shape index: {}]   ;;  %s819_s1 = inlined_call_operand.vmem [shape: bf16[3,64,33], index: 1, kind: input, shape index: {}]   ;;  %s820_s2 = inlined_call_operand.hbm [shape: f32[16,33], index: 2, kind: output, shape index: {}]  }
   0x1   :  { %9 = vsyncpa [#allocation3 + $0x1], 0  ;;  %s677_s9 = smov 0   ;;  %s679_s10 = smov 0  }
   0x2   :  { %s681_s11 = smov 0   ;;  %s683_s12 = smov 0  }
   0x3 LB: > { %s698_s13 = sadd.s32 4294967295, %s656_s12   ;;  %s448_s14 = sadd.s32 4294967294, %s656_s12   ;;  %s656_s12 = sphi %s683_s12, %s826_s12   ;;  %s652_s11 = sphi %s681_s11, %s825_s11   ;;  %s648_s10 = sphi %s679_s10, %s824_s10   ;;  %s644_s9 = sphi %s677_s9, %s823_s9  }
   0x4   : > { %s702_s15 = sadd.s32 1, %s656_s12   ;;  %s69_s16 = sadd.s32 1, %s652_s11 }
   0x5   : > { %s66_s17 = ssub.s32 %s656_s12, %s702_s15  ;;  %p79_p0 = scmp.ne.s32.totalorder %s652_s11, %s648_s10 }
   0x6   : > { %p67_p1 = scmp.eq.s32.totalorder %s66_s17, 0  ;;  %p80_p2 = scmp.eq.s32.totalorder %s698_s13, 1 }
   0x7   : > { %p85_p3 = scmp.ne.s32.totalorder %s648_s10, %s644_s9  ;;  %p86_p4 = scmp.eq.s32.totalorder %s448_s14, 1 }
   0x8   : > { %s713_s18 = scalar_select %p67_p1, %s652_s11, %s69_s16  }
   0x9   : > { %p715_p5 = por %p80_p2, %p79_p0  ;;  %p719_p6 = por %p86_p4, %p85_p3 }
   0xa   : > { %p451_p7 = scmp.ge.s32.totalorder %s656_s12, 1  ;;  %p114_p8 = scmp.lt.s32.totalorder %s656_s12, 3 }
   0xc   : > { %p115_p9 = pnand %p451_p7, %p114_p8 }
   0xd   : > { %p135_p10 = scmp.lt.s32.totalorder (!%p115_p9), %s698_s13, 1  ;;  %s132_s3 = sand.u32 (!%p115_p9), 1, %s648_s10  }
   0xe   : > { %118 = sbr.rel (%p115_p9) target bundleno = 377 (0x179), region = 28  ;;  %s452_s4 = sshll.u32 (!%p115_p9), %s132_s3, 3 }
   0xf   : > { %s134_s6 = scalar_lea.vmem (!%p115_p9), [#allocation2], %s452_s4  ;;  %s661_s21 = smov (!%p115_p9), [#allocation2]  }
  0x10   : > { %s389_s7 = sshll.u32 (!%p115_p9), %s134_s6, 4  ;;  %s600_s22 = sshll.u32 (!%p115_p9), %s661_s21, 4  ;;  %s779_s7 = int_to_ptr.vmem [resolvable:$true] %s389_s7  ;;  %s601_s22 = int_to_ptr.vmem [resolvable:$false] %s600_s22 }
  0x11   : > { %s596_s17 = scalar_lea.vmem (!%p115_p9), %s779_s7, 128  ;;  %p603_p0 = scmp.lt.s32.totalorder (!%p115_p9), %s779_s7, %s601_s22 }
  0x12   : > { %p597_p11 = scmp.ne.s32.totalorder (!%p115_p9), %s779_s7, %s596_s17 }
  0x13   : > { %v584_v0 = vld [vmem:[%s819_s1 + $0x38] sm:$0xff]   ;;  %v658_v1 = vmov 0   ;;  %v659_v2 = vmov 0.0   ;;  %s136_s23 = scalar_select %p135_p10, %s698_s13, 1  ;;  %v586_v4 = vld [vmem:[%s819_s1 + $0x30] sm:$0xff]   ;;  %v588_v7 = vld [vmem:[%s819_s1 + $0x28] sm:$0xff]   ;;  %v141_v11 = vlaneseq }
  0x14   : > { %583 = vset.pattern.permute.xlu0 %v658_v1  ;;  %505 = vmatprep.subr.bf16.mxu0 %v659_v2  ;;  %v585_v3 = vld [vmem:[%s819_s1 + $0x18] sm:$0xff]   ;;  %v587_v5 = vld [vmem:[%s819_s1 + $0x10] sm:$0xff]   ;;  %vm660_vm0 = vmmov 0   ;;  %v589_v8 = vld [vmem:[%s819_s1 + $0x8] sm:$0xff]   ;;  %vm191_vm2 = vcmask 523264   ;;  %vm373_vm3 = vcmask 269312   ;;  %p598_p12 = pnand %p597_p11, %p715_p5 }
  0x15   : > { %506 = vmatpush3.bf16.msra.mxu0 %v584_v0  ;;  %517 = vmatprep.subr.bf16.mxu1 %v659_v2  ;;  %s453_s28 = sshll.u32 %s136_s23, 3  ;;  %v590_v9 = vld [vmem:[%s819_s1 + $0x20] sm:$0xff]   ;;  %v142_v12 = vand.u32 127, %v141_v11  ;;  %v592_v15 = vld [vmem:[%s819_s1 + $0x58] sm:$0xff]   ;;  %v593_v17 = vld [vmem:[%s819_s1 + $0x50] sm:$0xff]   ;;  %s602_s23 = scalar_lea.vmem %s601_s22, 256 }
  0x16   : > { %507 = vmatprep.subr.bf16.mxu0 %v659_v2  ;;  %518 = vmatpush3.bf16.msra.mxu1 %v585_v3  ;;  %s138_s5 = scalar_lea.vmem %s818_s0, %s453_s28  ;;  %v591_v10 = vld [vmem:[%s819_s1] sm:$0xff]   ;;  %v594_v18 = vld [vmem:[%s819_s1 + $0x48] sm:$0xff]   ;;  %p599_p13 = pneg %p598_p12 }
  0x17   : > { %519 = vmatprep.subr.bf16.mxu1 %v659_v2  ;;  %v140_v6 = vld [vmem:[%s138_s5] sm:$0xff]  ;;  %513 = vmatprep.mubr.msk.bf16.mxu0 %vm660_vm0, %v659_v2  ;;  %s487_s5 = sshll.u32 %s698_s13, 7  ;;  %s376_s13 = scalar_lea.sflag [#allocation3], %s132_s3 }
  0x18   : > { %144 = vperm.xlu0 %583, %v140_v6   ;;  %525 = vmatprep.mubr.msk.bf16.mxu1 %vm660_vm0, %v659_v2  ;;  %v595_v19 = vld [vmem:[%s819_s1 + $0x40] sm:$0xff]   ;;  %s777_s16 = scalar_lea.hbm %s820_s2, %s487_s5  ;;  %p604_p1 = scmp.lt.s32.totalorder %s602_s23, %s596_s17 }
  0x19   : > { %508 = vmatpush3.bf16.msra.mxu0 %v586_v4 }
  0x1a   : > { %509 = vmatprep.subr.bf16.mxu0 %v659_v2  ;;  %520 = vmatpush3.bf16.msra.mxu1 %v587_v5  ;;  %p605_p2 = por %p604_p1, %p603_p0 }
  0x1b   : > { %521 = vmatprep.subr.bf16.mxu1 %v659_v2 }
  0x1c   : > { %p606_p3 = pnand %p605_p2, %p599_p13 }
  0x1d   : > { %510 = vmatpush3.bf16.msra.mxu0 %v588_v7 }
  0x1e   : > { %511 = vmatprep.subr.bf16.mxu0 %v659_v2  ;;  %522 = vmatpush3.bf16.msra.mxu1 %v589_v8 }
  0x1f   : > { %523 = vmatprep.subr.bf16.mxu1 %v659_v2 }
  0x21   : > { %512 = vmatpush3.bf16.msra.mxu0 %v590_v9 }
  0x22   : > { %529 = vmatprep.subr.bf16.mxu0 %v659_v2  ;;  %524 = vmatpush3.bf16.msra.mxu1 %v591_v10 }
  0x93   : > { %v145_v13 = vpop.permute.xlu0 %144 }
  0x94   : > { %vm146_vm1 = vcmp.eq.s32.totalorder %v142_v12, %v145_v13 }
  0x95   : > { %v454_v14 = vsel %vm146_vm1, 1.0, %v659_v2 }
  0x96   : > { %v149_v16 = vpack.c.bf16 %v454_v14, %v454_v14 }
  0x98   : > { %514 = vmatmul.mubr.msk.bf16.vlgmr.msra.gmra.mxu0 %vm191_vm2, %v149_v16  ;;  %526 = vmatmul.mubr.msk.bf16.vlgmr.msra.gmra.mxu1 %vm191_vm2, %v149_v16 }
  0x99   : > { %530 = vmatpush3.bf16.msra.mxu0 %v592_v15  ;;  %537 = vmatprep.mubr.msk.bf16.mxu0 %vm660_vm0, %v659_v2 }
  0x9a   : > { %531 = vmatprep.subr.bf16.mxu0 %v659_v2 }
  0x9d   : > { %532 = vmatpush3.bf16.msra.mxu0 %v593_v17 }
  0x9e   : > { %533 = vmatprep.subr.bf16.mxu0 %v659_v2 }
  0xa1   : > { %534 = vmatpush3.bf16.msra.mxu0 %v594_v18 }
  0xa2   : > { %535 = vmatprep.subr.bf16.mxu0 %v659_v2 }
  0xa5   : > { %536 = vmatpush3.bf16.msra.mxu0 %v595_v19 }
  0xa8   : > { %538 = vmatmul.mubr.msk.bf16.vlgmr.msra.gmra.mxu0 %vm191_vm2, %v149_v16 }
 0x158   : > { %v229_v20 = vpop.f32.mrf.mxu0  ;;  %v293_v21 = vpop.f32.mrf.mxu1 }
 0x159   : > { %v294_v28 = vadd.f32 %v293_v21, %v229_v20 }
 0x15a   : > { %v515_v22 = vpop.f32.mrf.mxu0  ;;  %v527_v23 = vpop.f32.mrf.mxu1 }
 0x15c   : > { %v232_v24 = vpop.f32.mrf.mxu0  ;;  %v296_v25 = vpop.f32.mrf.mxu1 }
 0x15e   : > { %v516_v26 = vpop.f32.mrf.mxu0  ;;  %v528_v27 = vpop.f32.mrf.mxu1 }
 0x168   : > { %v366_v29 = vpop.f32.mrf.mxu0 }
 0x169   : > { %v372_v30 = vadd.f32 %v366_v29, %v294_v28 }
 0x16a   : > { %v539_v31 = vpop.f32.mrf.mxu0 }
 0x16b   : > { %374 = vst.msk [vmem:[%s134_s6] sm:$0xff] %vm373_vm3, %v372_v30 }
 0x16c   : > { %v369_v32 = vpop.f32.mrf.mxu0 }
 0x16d   : > { %609 = shalt.err (!%p606_p3)
}
 0x16e   : > { %s610_s24 = scalar_lea.hbm %s777_s16, 128  ;;  %s614_s27 = scalar_lea.hbm %s820_s2, 256 }
 0x16f   : > { %p611_p4 = scmp.ne.s32.totalorder %s777_s16, %s610_s24  ;;  %p615_p9 = scmp.lt.s32.totalorder %s777_s16, %s820_s2 }
 0x170   : > { %p616_p10 = scmp.lt.s32.totalorder %s614_s27, %s610_s24 }
 0x171   : > { %p612_p7 = pnand %p611_p4, %p715_p5 }
 0x172   : > { %p617_p11 = por %p616_p10, %p615_p9 }
 0x173   : > { %p613_p8 = pneg %p612_p7 }
 0x175   : > { %p618_p12 = pnand %p617_p11, %p613_p8 }
 0x177   : > { %621 = shalt.err (!%p618_p12)
}
 0x178   : > { %541 = dma.vmem_to_hbm [thread:$0]  (%p715_p5), %s779_s7, 128, %s777_s16, %s376_s13   ;;  %v540_v33 = vpop.f32.mrf.mxu0 }
 0x179 PF: > { %p547_p13 = scmp.ge.s32.totalorder %s656_s12, 2  ;;  %s401_s30 = sand.u32 1, %s644_s9  }
 0x17a   : > { %s402_s3 = scalar_lea.sflag [#allocation3], %s401_s30 }
 0x17b   : > { %p544_p0 = pnand %p547_p13, %p719_p6 }
 0x17d   : > { %p545_p1 = pneg %p544_p0 }
 0x17f   : > { %639 = dma.done.wait (%p545_p1), %s402_s3, 128  }
 0x180   : > { %641 = vsyncadd (%p545_p1), %s402_s3, 4294967168  ;;  %p12_p2 = scmp.ge.s32.totalorder %s702_s15, 4   ;;  %s823_s9 = smov %s648_s10 }
 0x181   : > { %s824_s10 = smov %s652_s11  ;;  %s825_s11 = smov %s713_s18 }
 0x182   : > { %s826_s12 = smov %s702_s15  ;;  %14 = sbr.rel (!%p12_p2) target bundleno = 3 (0x3), region = 65 }
 0x187   :  { %407 = vsyncpa [#allocation3], 1 }
 0x188   :  { %409 = vsyncpa [#allocation3 + $0x1], 1 }

</bundles_post_ra>
